<compile_context>
chip_gen: v7x
topology: tpu7x:2x2x1
jax: 0.10.0
libtpu: 0.0.40
codegen_flags: <defaults>
</compile_context>

<pallas_src>
import functools

import jax
import jax.numpy as jnp
from jax import lax
from jax.experimental import pallas as pl
from jax.experimental.pallas import tpu as pltpu


# ---------------------------------------------------------------------------
# Shared in-kernel im2col: stage a (9*C, H*W) patch matrix in VMEM scratch.
# Tap ordering is (kh, kw)-major / input-channel-minor, matching weights
# reshaped via transpose(OIHW -> O,KH,KW,I).reshape(Cout, 9*Cin).
# Only ref-slice loads/stores + elementwise masks are used (no value concat,
# no value pad, no roll) so lowering is unambiguous.
# ---------------------------------------------------------------------------
def _im2col(x, xpad_ref, patch_ref, h, w):
    # x: (C, H*W) f32, row-major spatial (index = row*W + col).
    c, hw = x.shape
    # zero-padded flat copy: W+1 zeros on each side absorb the north/south halo
    xpad_ref[...] = jnp.zeros((c, hw + 2 * w + 2), jnp.float32)
    xpad_ref[:, w + 1:w + 1 + hw] = x

    col = lax.broadcasted_iota(jnp.int32, (c, hw), 1) % w
    west_ok = col >= 1          # output pixel has a valid west neighbour
    east_ok = col <= w - 2      # output pixel has a valid east neighbour

    tap = 0
    for dh in (-1, 0, 1):
        for dw in (-1, 0, 1):
            start = (w + 1) + dh * w + dw
            t = xpad_ref[:, start:start + hw]          # shifted window load
            if dw == -1:                               # mask row-boundary wrap
                t = jnp.where(west_ok, t, 0.0)
            elif dw == 1:
                t = jnp.where(east_ok, t, 0.0)
            patch_ref[tap * c:(tap + 1) * c, :] = t
            tap += 1


# ---------------------------------------------------------------------------
# Kernel 1: conv1 (no bias) + per-batch-element BatchNorm partial statistics.
# One batch element per grid step (parallel axis).
# ---------------------------------------------------------------------------
def _conv1_stats_kernel(x_ref, w_ref, y_ref, sum_ref, m2_ref,
                        xpad_ref, patch_ref, *, h, w):
    # x_ref: (Cin, H*W)   w_ref: (Cout, 9*Cin)
    # y_ref: (Cout, H*W)  sum_ref / m2_ref: (Cout, 1)
    x = x_ref[...].astype(jnp.float32)
    _im2col(x, xpad_ref, patch_ref, h, w)
    y = jnp.dot(w_ref[...], patch_ref[...],
                preferred_element_type=jnp.float32)        # (Cout, H*W)
    y_ref[...] = y

    # Per-element stats (centered sum-of-squares -> numerically stable combine).
    inv_hw = 1.0 / float(h * w)
    s = jnp.sum(y, axis=1, keepdims=True)                  # (Cout, 1)
    d = y - s * inv_hw
    sum_ref[...] = s
    m2_ref[...] = jnp.sum(d * d, axis=1, keepdims=True)


# ---------------------------------------------------------------------------
# Kernel 2: fused BatchNorm affine + ReLU prologue, then conv2 + bias + ReLU.
# ---------------------------------------------------------------------------
def _bn_conv2_kernel(y_ref, scale_ref, shift_ref, w_ref, b_ref, o_ref,
                     xpad_ref, patch_ref, *, h, w):
    # y_ref: (Cout, H*W)  scale/shift/b: (Cout, 1)  w_ref: (Cout, 9*Cout)
    a = jnp.maximum(y_ref[...] * scale_ref[...] + shift_ref[...], 0.0)
    _im2col(a, xpad_ref, patch_ref, h, w)
    acc = jnp.dot(w_ref[...], patch_ref[...],
                  preferred_element_type=jnp.float32)      # (Cout, H*W)
    o_ref[...] = jnp.maximum(acc + b_ref[...], 0.0).astype(o_ref.dtype)


# ---------------------------------------------------------------------------
# Full ConvBlock forward (NCHW in / NCHW out; only free reshapes in the wrapper).
# ---------------------------------------------------------------------------
def conv_block_forward(x_nchw, params, eps=1e-5):
    w1_2d, gamma, beta, w2_2d, b2 = params
    n, cin, h, w = x_nchw.shape
    cout = w1_2d.shape[0]
    hw = h * w

    x_flat = x_nchw.reshape(n, cin, hw)                    # free reshape

    # ---- pallas_call 1: conv1 + BN partial stats ----
    kern1 = functools.partial(_conv1_stats_kernel, h=h, w=w)
    y1, psum, pm2 = pl.pallas_call(
        kern1,
        out_shape=(jax.ShapeDtypeStruct((n, cout, hw), jnp.float32),
                   jax.ShapeDtypeStruct((n, cout, 1), jnp.float32),
                   jax.ShapeDtypeStruct((n, cout, 1), jnp.float32)),
        grid_spec=pltpu.PrefetchScalarGridSpec(
            num_scalar_prefetch=0,
            grid=(n,),
            in_specs=[
                pl.BlockSpec((None, cin, hw), lambda b: (b, 0, 0)),
                pl.BlockSpec((cout, 9 * cin), lambda b: (0, 0)),
            ],
            out_specs=[
                pl.BlockSpec((None, cout, hw), lambda b: (b, 0, 0)),
                pl.BlockSpec((None, cout, 1), lambda b: (b, 0, 0)),
                pl.BlockSpec((None, cout, 1), lambda b: (b, 0, 0)),
            ],
            scratch_shapes=[
                pltpu.VMEM((cin, hw + 2 * w + 2), jnp.float32),
                pltpu.VMEM((9 * cin, hw), jnp.float32),
            ]),
        compiler_params=pltpu.CompilerParams(
            dimension_semantics=("parallel",)),
    )(x_flat, w1_2d)

    # ---- tiny (C,)-sized batch-stat combine (Chan) + BN fold ----
    cnt_b = jnp.float32(hw)
    total = jnp.float32(n * hw)
    sums = psum[:, :, 0]                                   # (N, C)
    m2s = pm2[:, :, 0]                                     # (N, C)
    mean_b = sums / cnt_b
    mean = jnp.sum(sums, axis=0) / total                   # (C,)
    m2 = jnp.sum(m2s + cnt_b * (mean_b - mean[None, :]) ** 2, axis=0)
    var = m2 / total                                       # biased variance
    scale = gamma / jnp.sqrt(var + eps)
    shift = beta - mean * scale
    # TODO(synk): running_mean / running_var buffer updates (training-time module
    # state) are not reproduced; only the forward activations are.

    # ---- pallas_call 2: BN+ReLU prologue fused into conv2 + bias + ReLU ----
    kern2 = functools.partial(_bn_conv2_kernel, h=h, w=w)
    out = pl.pallas_call(
        kern2,
        out_shape=jax.ShapeDtypeStruct((n, cout, hw), jnp.float32),
        grid_spec=pltpu.PrefetchScalarGridSpec(
            num_scalar_prefetch=0,
            grid=(n,),
            in_specs=[
                pl.BlockSpec((None, cout, hw), lambda b: (b, 0, 0)),
                pl.BlockSpec((cout, 1), lambda b: (0, 0)),
                pl.BlockSpec((cout, 1), lambda b: (0, 0)),
                pl.BlockSpec((cout, 9 * cout), lambda b: (0, 0)),
                pl.BlockSpec((cout, 1), lambda b: (0, 0)),
            ],
            out_specs=pl.BlockSpec((None, cout, hw), lambda b: (b, 0, 0)),
            scratch_shapes=[
                pltpu.VMEM((cout, hw + 2 * w + 2), jnp.float32),
                pltpu.VMEM((9 * cout, hw), jnp.float32),
            ]),
        compiler_params=pltpu.CompilerParams(
            dimension_semantics=("parallel",)),
    )(y1, scale.reshape(cout, 1), shift.reshape(cout, 1), w2_2d,
      b2.reshape(cout, 1))

    return out.reshape(n, cout, h, w)                      # free reshape


# ---------------------------------------------------------------------------
# Pure-JAX reference (correctness check).
# ---------------------------------------------------------------------------
def ref_forward(x_nchw, w1_oihw, gamma, beta, w2_oihw, b2, eps=1e-5):
    dn = ('NCHW', 'OIHW', 'NCHW')
    y1 = lax.conv_general_dilated(x_nchw, w1_oihw, (1, 1), 'SAME',
                                  dimension_numbers=dn)
    mean = y1.mean(axis=(0, 2, 3), keepdims=True)
    var = y1.var(axis=(0, 2, 3), keepdims=True)            # biased variance
    y1n = (y1 - mean) / jnp.sqrt(var + eps)
    y1n = y1n * gamma[None, :, None, None] + beta[None, :, None, None]
    a = jnp.maximum(y1n, 0.0)
    y2 = lax.conv_general_dilated(a, w2_oihw, (1, 1), 'SAME',
                                  dimension_numbers=dn)
    y2 = y2 + b2[None, :, None, None]
    return jnp.maximum(y2, 0.0)


if __name__ == "__main__":
    N, CH_IN, CH_OUT, H, W = 2, 4, 8, 16, 16

    key = jax.random.PRNGKey(0)
    k_x, k_w1, k_g, k_b, k_w2, k_b2 = jax.random.split(key, 6)

    x_nchw = jax.random.normal(k_x, (N, CH_IN, H, W), jnp.float32)
    w1_oihw = 0.3 * jax.random.normal(k_w1, (CH_OUT, CH_IN, 3, 3), jnp.float32)
    gamma = 1.0 + 0.1 * jax.random.normal(k_g, (CH_OUT,), jnp.float32)
    beta = 0.1 * jax.random.normal(k_b, (CH_OUT,), jnp.float32)
    w2_oihw = 0.3 * jax.random.normal(k_w2, (CH_OUT, CH_OUT, 3, 3), jnp.float32)
    b2 = 0.1 * jax.random.normal(k_b2, (CH_OUT,), jnp.float32)

    # One-time weight re-layout: OIHW -> (Cout, 9*Cin), tap-major / Cin-minor.
    w1_2d = jnp.transpose(w1_oihw, (0, 2, 3, 1)).reshape(CH_OUT, 9 * CH_IN)
    w2_2d = jnp.transpose(w2_oihw, (0, 2, 3, 1)).reshape(CH_OUT, 9 * CH_OUT)
    params = (w1_2d, gamma, beta, w2_2d, b2)

    fwd = jax.jit(conv_block_forward)
    out = jax.block_until_ready(fwd(x_nchw, params))
    ref = jax.block_until_ready(
        ref_forward(x_nchw, w1_oihw, gamma, beta, w2_oihw, b2))

    assert out.shape == (N, CH_OUT, H, W), out.shape
    assert jnp.allclose(out, ref, atol=1e-4, rtol=1e-4), \
        float(jnp.max(jnp.abs(out - ref)))

    print("KERNEL_OK")
</pallas_src>

<mosaic_0001>
module attributes {stable_mosaic.version = 11 : i64} {
  func.func @_conv1_stats_kernel(%arg0: i32, %arg1: memref<1x4x256xf32, #tpu.memory_space<vmem>>, %arg2: memref<8x36xf32, #tpu.memory_space<vmem>>, %arg3: memref<1x8x256xf32, #tpu.memory_space<vmem>>, %arg4: memref<1x8x1xf32, #tpu.memory_space<vmem>>, %arg5: memref<1x8x1xf32, #tpu.memory_space<vmem>>, %arg6: memref<4x290xf32, #tpu.memory_space<vmem>>, %arg7: memref<36x256xf32, #tpu.memory_space<vmem>>) attributes {dimension_semantics = [#tpu.dimension_semantics<parallel>], iteration_bounds = array<i64: 2>, scalar_prefetch = 0 : i64, scratch_operands = 2 : i64, tpu.core_type = #tpu.core_type<tc>, window_params = [{transform_indices = @transform_0, window_bounds = array<i64: 1, 4, 256>}, {pipeline_mode = #tpu.pipeline_mode<synchronous>, transform_indices = @transform_1, window_bounds = array<i64: 8, 36>}, {transform_indices = @transform_2, window_bounds = array<i64: 1, 8, 256>}, {transform_indices = @transform_3, window_bounds = array<i64: 1, 8, 1>}, {transform_indices = @transform_4, window_bounds = array<i64: 1, 8, 1>}]} {
    %c0 = arith.constant 0 : index
    %c0_0 = arith.constant 0 : index
    %c0_1 = arith.constant 0 : index
    %0 = vector.load %arg1[%c0, %c0_0, %c0_1] : memref<1x4x256xf32, #tpu.memory_space<vmem>>, vector<1x4x256xf32>
    %1 = vector.shape_cast %0 : vector<1x4x256xf32> to vector<4x256xf32>
    %cst = arith.constant 0.000000e+00 : f32
    %2 = vector.broadcast %cst : f32 to vector<4x290xf32>
    %c0_2 = arith.constant 0 : index
    %c0_3 = arith.constant 0 : index
    %3 = vector.load %arg6[%c0_2, %c0_3] : memref<4x290xf32, #tpu.memory_space<vmem>>, vector<4x290xf32>
    tpu.vector_store %arg6[%c0_2, %c0_3], %2 {strides = array<i32>} : memref<4x290xf32, #tpu.memory_space<vmem>>, vector<4x290xf32>,
    %c0_4 = arith.constant 0 : index
    %c17 = arith.constant 17 : index
    %4 = vector.load %arg6[%c0_4, %c17] : memref<4x290xf32, #tpu.memory_space<vmem>>, vector<4x256xf32>
    tpu.vector_store %arg6[%c0_4, %c17], %1 {strides = array<i32>} : memref<4x290xf32, #tpu.memory_space<vmem>>, vector<4x256xf32>,
    %5 = tpu.iota {dimensions = array<i32: 1>} : vector<4x256xi32>
    %c16_i32 = arith.constant 16 : i32
    %c0_i32 = arith.constant 0 : i32
    %6 = arith.cmpi eq, %c16_i32, %c0_i32 : i32
    %c1_i32 = arith.constant 1 : i32
    %7 = arith.select %6, %c1_i32, %c16_i32 : i32
    %8 = vector.broadcast %7 : i32 to vector<4x256xi32>
    %9 = arith.remsi %5, %8 : vector<4x256xi32>
    %c0_i32_5 = arith.constant 0 : i32
    %10 = vector.broadcast %c0_i32_5 : i32 to vector<4x256xi32>
    %11 = arith.cmpi ne, %9, %10 : vector<4x256xi32>
    %c0_i32_6 = arith.constant 0 : i32
    %12 = vector.broadcast %c0_i32_6 : i32 to vector<4x256xi32>
    %13 = arith.cmpi slt, %9, %12 : vector<4x256xi32>
    %c0_i32_7 = arith.constant 0 : i32
    %14 = arith.cmpi slt, %7, %c0_i32_7 : i32
    %15 = vector.broadcast %14 : i1 to vector<4x256xi1>
    %16 = vector.broadcast %15 : vector<4x256xi1> to vector<4x256xi1>
    %17 = arith.xori %13, %16 : vector<4x256xi1>
    %18 = arith.andi %17, %11 : vector<4x256xi1>
    %19 = vector.broadcast %7 : i32 to vector<4x256xi32>
    %20 = arith.addi %9, %19 : vector<4x256xi32>
    %21 = arith.select %18, %20, %9 : vector<4x256xi1>, vector<4x256xi32>
    %c1_i32_8 = arith.constant 1 : i32
    %22 = vector.broadcast %c1_i32_8 : i32 to vector<4x256xi32>
    %23 = arith.cmpi sge, %21, %22 : vector<4x256xi32>
    %c14_i32 = arith.constant 14 : i32
    %24 = vector.broadcast %c14_i32 : i32 to vector<4x256xi32>
    %25 = arith.cmpi sle, %21, %24 : vector<4x256xi32>
    %c0_9 = arith.constant 0 : index
    %c0_10 = arith.constant 0 : index
    %26 = vector.load %arg6[%c0_9, %c0_10] : memref<4x290xf32, #tpu.memory_space<vmem>>, vector<4x256xf32>
    %cst_11 = arith.constant 0.000000e+00 : f32
    %27 = vector.broadcast %cst_11 : f32 to vector<4x256xf32>
    %28 = arith.select %23, %26, %27 : vector<4x256xi1>, vector<4x256xf32>
    %c0_12 = arith.constant 0 : index
    %c0_13 = arith.constant 0 : index
    %29 = vector.load %arg7[%c0_12, %c0_13] : memref<36x256xf32, #tpu.memory_space<vmem>>, vector<4x256xf32>
    tpu.vector_store %arg7[%c0_12, %c0_13], %28 {strides = array<i32>} : memref<36x256xf32, #tpu.memory_space<vmem>>, vector<4x256xf32>,
    %c0_14 = arith.constant 0 : index
    %c1 = arith.constant 1 : index
    %30 = vector.load %arg6[%c0_14, %c1] : memref<4x290xf32, #tpu.memory_space<vmem>>, vector<4x256xf32>
    %c4 = arith.constant 4 : index
    %c0_15 = arith.constant 0 : index
    %31 = vector.load %arg7[%c4, %c0_15] : memref<36x256xf32, #tpu.memory_space<vmem>>, vector<4x256xf32>
    tpu.vector_store %arg7[%c4, %c0_15], %30 {strides = array<i32>} : memref<36x256xf32, #tpu.memory_space<vmem>>, vector<4x256xf32>,
    %c0_16 = arith.constant 0 : index
    %c2 = arith.constant 2 : index
    %32 = vector.load %arg6[%c0_16, %c2] : memref<4x290xf32, #tpu.memory_space<vmem>>, vector<4x256xf32>
    %cst_17 = arith.constant 0.000000e+00 : f32
    %33 = vector.broadcast %cst_17 : f32 to vector<4x256xf32>
    %34 = arith.select %25, %32, %33 : vector<4x256xi1>, vector<4x256xf32>
    %c8 = arith.constant 8 : index
    %c0_18 = arith.constant 0 : index
    %35 = vector.load %arg7[%c8, %c0_18] : memref<36x256xf32, #tpu.memory_space<vmem>>, vector<4x256xf32>
    tpu.vector_store %arg7[%c8, %c0_18], %34 {strides = array<i32>} : memref<36x256xf32, #tpu.memory_space<vmem>>, vector<4x256xf32>,
    %c0_19 = arith.constant 0 : index
    %c16 = arith.constant 16 : index
    %36 = vector.load %arg6[%c0_19, %c16] : memref<4x290xf32, #tpu.memory_space<vmem>>, vector<4x256xf32>
    %cst_20 = arith.constant 0.000000e+00 : f32
    %37 = vector.broadcast %cst_20 : f32 to vector<4x256xf32>
    %38 = arith.select %23, %36, %37 : vector<4x256xi1>, vector<4x256xf32>
    %c12 = arith.constant 12 : index
    %c0_21 = arith.constant 0 : index
    %39 = vector.load %arg7[%c12, %c0_21] : memref<36x256xf32, #tpu.memory_space<vmem>>, vector<4x256xf32>
    tpu.vector_store %arg7[%c12, %c0_21], %38 {strides = array<i32>} : memref<36x256xf32, #tpu.memory_space<vmem>>, vector<4x256xf32>,
    %c0_22 = arith.constant 0 : index
    %c17_23 = arith.constant 17 : index
    %40 = vector.load %arg6[%c0_22, %c17_23] : memref<4x290xf32, #tpu.memory_space<vmem>>, vector<4x256xf32>
    %c16_24 = arith.constant 16 : index
    %c0_25 = arith.constant 0 : index
    %41 = vector.load %arg7[%c16_24, %c0_25] : memref<36x256xf32, #tpu.memory_space<vmem>>, vector<4x256xf32>
    tpu.vector_store %arg7[%c16_24, %c0_25], %40 {strides = array<i32>} : memref<36x256xf32, #tpu.memory_space<vmem>>, vector<4x256xf32>,
    %c0_26 = arith.constant 0 : index
    %c18 = arith.constant 18 : index
    %42 = vector.load %arg6[%c0_26, %c18] : memref<4x290xf32, #tpu.memory_space<vmem>>, vector<4x256xf32>
    %cst_27 = arith.constant 0.000000e+00 : f32
    %43 = vector.broadcast %cst_27 : f32 to vector<4x256xf32>
    %44 = arith.select %25, %42, %43 : vector<4x256xi1>, vector<4x256xf32>
    %c20 = arith.constant 20 : index
    %c0_28 = arith.constant 0 : index
    %45 = vector.load %arg7[%c20, %c0_28] : memref<36x256xf32, #tpu.memory_space<vmem>>, vector<4x256xf32>
    tpu.vector_store %arg7[%c20, %c0_28], %44 {strides = array<i32>} : memref<36x256xf32, #tpu.memory_space<vmem>>, vector<4x256xf32>,
    %c0_29 = arith.constant 0 : index
    %c32 = arith.constant 32 : index
    %46 = vector.load %arg6[%c0_29, %c32] : memref<4x290xf32, #tpu.memory_space<vmem>>, vector<4x256xf32>
    %cst_30 = arith.constant 0.000000e+00 : f32
    %47 = vector.broadcast %cst_30 : f32 to vector<4x256xf32>
    %48 = arith.select %23, %46, %47 : vector<4x256xi1>, vector<4x256xf32>
    %c24 = arith.constant 24 : index
    %c0_31 = arith.constant 0 : index
    %49 = vector.load %arg7[%c24, %c0_31] : memref<36x256xf32, #tpu.memory_space<vmem>>, vector<4x256xf32>
    tpu.vector_store %arg7[%c24, %c0_31], %48 {strides = array<i32>} : memref<36x256xf32, #tpu.memory_space<vmem>>, vector<4x256xf32>,
    %c0_32 = arith.constant 0 : index
    %c33 = arith.constant 33 : index
    %50 = vector.load %arg6[%c0_32, %c33] : memref<4x290xf32, #tpu.memory_space<vmem>>, vector<4x256xf32>
    %c28 = arith.constant 28 : index
    %c0_33 = arith.constant 0 : index
    %51 = vector.load %arg7[%c28, %c0_33] : memref<36x256xf32, #tpu.memory_space<vmem>>, vector<4x256xf32>
    tpu.vector_store %arg7[%c28, %c0_33], %50 {strides = array<i32>} : memref<36x256xf32, #tpu.memory_space<vmem>>, vector<4x256xf32>,
    %c0_34 = arith.constant 0 : index
    %c34 = arith.constant 34 : index
    %52 = vector.load %arg6[%c0_34, %c34] : memref<4x290xf32, #tpu.memory_space<vmem>>, vector<4x256xf32>
    %cst_35 = arith.constant 0.000000e+00 : f32
    %53 = vector.broadcast %cst_35 : f32 to vector<4x256xf32>
    %54 = arith.select %25, %52, %53 : vector<4x256xi1>, vector<4x256xf32>
    %c32_36 = arith.constant 32 : index
    %c0_37 = arith.constant 0 : index
    %55 = vector.load %arg7[%c32_36, %c0_37] : memref<36x256xf32, #tpu.memory_space<vmem>>, vector<4x256xf32>
    tpu.vector_store %arg7[%c32_36, %c0_37], %54 {strides = array<i32>} : memref<36x256xf32, #tpu.memory_space<vmem>>, vector<4x256xf32>,
    %c0_38 = arith.constant 0 : index
    %c0_39 = arith.constant 0 : index
    %56 = vector.load %arg2[%c0_38, %c0_39] : memref<8x36xf32, #tpu.memory_space<vmem>>, vector<8x36xf32>
    %c0_40 = arith.constant 0 : index
    %c0_41 = arith.constant 0 : index
    %57 = vector.load %arg7[%c0_40, %c0_41] : memref<36x256xf32, #tpu.memory_space<vmem>>, vector<36x256xf32>
    %cst_42 = arith.constant dense<0.000000e+00> : vector<8x256xf32>
    %58 = tpu.matmul %56, %57, %cst_42 {dimension_numbers = #tpu.dot_dimension_numbers<[1], [0], [0], [1], [0, 0, 1, 1], [], []>} : vector<8x36xf32>, vector<36x256xf32>, vector<8x256xf32> -> vector<8x256xf32>
    %c0_43 = arith.constant 0 : index
    %c0_44 = arith.constant 0 : index
    %c0_45 = arith.constant 0 : index
    %59 = vector.load %arg3[%c0_43, %c0_44, %c0_45] : memref<1x8x256xf32, #tpu.memory_space<vmem>>, vector<1x8x256xf32>
    %60 = vector.shape_cast %59 : vector<1x8x256xf32> to vector<8x256xf32>
    %61 = vector.shape_cast %58 : vector<8x256xf32> to vector<1x8x256xf32>
    tpu.vector_store %arg3[%c0_43, %c0_44, %c0_45], %61 {strides = array<i32>} : memref<1x8x256xf32, #tpu.memory_space<vmem>>, vector<1x8x256xf32>,
    %cst_46 = arith.constant dense<0.000000e+00> : vector<8xf32>
    %62 = vector.multi_reduction <add>, %58, %cst_46 [1] : vector<8x256xf32> to vector<8xf32>
    %63 = vector.shape_cast %62 : vector<8xf32> to vector<8x1xf32>
    %cst_47 = arith.constant 3.906250e-03 : f32
    %64 = vector.broadcast %cst_47 : f32 to vector<8x1xf32>
    %65 = arith.mulf %63, %64 : vector<8x1xf32>
    %66 = vector.broadcast %65 : vector<8x1xf32> to vector<8x256xf32>
    %67 = arith.subf %58, %66 : vector<8x256xf32>
    %c0_48 = arith.constant 0 : index
    %c0_49 = arith.constant 0 : index
    %c0_50 = arith.constant 0 : index
    %68 = vector.load %arg4[%c0_48, %c0_49, %c0_50] : memref<1x8x1xf32, #tpu.memory_space<vmem>>, vector<1x8x1xf32>
    %69 = vector.shape_cast %68 : vector<1x8x1xf32> to vector<8x1xf32>
    %70 = vector.shape_cast %63 : vector<8x1xf32> to vector<1x8x1xf32>
    tpu.vector_store %arg4[%c0_48, %c0_49, %c0_50], %70 {strides = array<i32>} : memref<1x8x1xf32, #tpu.memory_space<vmem>>, vector<1x8x1xf32>,
    %71 = arith.mulf %67, %67 : vector<8x256xf32>
    %cst_51 = arith.constant dense<0.000000e+00> : vector<8xf32>
    %72 = vector.multi_reduction <add>, %71, %cst_51 [1] : vector<8x256xf32> to vector<8xf32>
    %73 = vector.shape_cast %72 : vector<8xf32> to vector<8x1xf32>
    %c0_52 = arith.constant 0 : index
    %c0_53 = arith.constant 0 : index
    %c0_54 = arith.constant 0 : index
    %74 = vector.load %arg5[%c0_52, %c0_53, %c0_54] : memref<1x8x1xf32, #tpu.memory_space<vmem>>, vector<1x8x1xf32>
    %75 = vector.shape_cast %74 : vector<1x8x1xf32> to vector<8x1xf32>
    %76 = vector.shape_cast %73 : vector<8x1xf32> to vector<1x8x1xf32>
    tpu.vector_store %arg5[%c0_52, %c0_53, %c0_54], %76 {strides = array<i32>} : memref<1x8x1xf32, #tpu.memory_space<vmem>>, vector<1x8x1xf32>,
    return
  }
  func.func @transform_0(%arg0: i32) -> (i32, i32, i32) {
    %c0_i32 = arith.constant 0 : i32
    %c0_i32_0 = arith.constant 0 : i32
    %c0_i32_1 = arith.constant 0 : i32
    return %arg0, %c0_i32, %c0_i32_0 : i32, i32, i32
  }
  func.func @transform_1(%arg0: i32) -> (i32, i32) {
    %c0_i32 = arith.constant 0 : i32
    %c0_i32_0 = arith.constant 0 : i32
    %c0_i32_1 = arith.constant 0 : i32
    return %c0_i32, %c0_i32_0 : i32, i32
  }
  func.func @transform_2(%arg0: i32) -> (i32, i32, i32) {
    %c0_i32 = arith.constant 0 : i32
    %c0_i32_0 = arith.constant 0 : i32
    %c0_i32_1 = arith.constant 0 : i32
    return %arg0, %c0_i32, %c0_i32_0 : i32, i32, i32
  }
  func.func @transform_3(%arg0: i32) -> (i32, i32, i32) {
    %c0_i32 = arith.constant 0 : i32
    %c0_i32_0 = arith.constant 0 : i32
    %c0_i32_1 = arith.constant 0 : i32
    return %arg0, %c0_i32, %c0_i32_0 : i32, i32, i32
  }
  func.func @transform_4(%arg0: i32) -> (i32, i32, i32) {
    %c0_i32 = arith.constant 0 : i32
    %c0_i32_0 = arith.constant 0 : i32
    %c0_i32_1 = arith.constant 0 : i32
    return %arg0, %c0_i32, %c0_i32_0 : i32, i32, i32
  }
}

module attributes {stable_mosaic.version = 11 : i64} {
  func.func @_bn_conv2_kernel(%arg0: i32, %arg1: memref<1x8x256xf32, #tpu.memory_space<vmem>>, %arg2: memref<8x1xf32, #tpu.memory_space<vmem>>, %arg3: memref<8x1xf32, #tpu.memory_space<vmem>>, %arg4: memref<8x72xf32, #tpu.memory_space<vmem>>, %arg5: memref<8x1xf32, #tpu.memory_space<vmem>>, %arg6: memref<1x8x256xf32, #tpu.memory_space<vmem>>, %arg7: memref<8x290xf32, #tpu.memory_space<vmem>>, %arg8: memref<72x256xf32, #tpu.memory_space<vmem>>) attributes {dimension_semantics = [#tpu.dimension_semantics<parallel>], iteration_bounds = array<i64: 2>, scalar_prefetch = 0 : i64, scratch_operands = 2 : i64, tpu.core_type = #tpu.core_type<tc>, window_params = [{transform_indices = @transform_0, window_bounds = array<i64: 1, 8, 256>}, {pipeline_mode = #tpu.pipeline_mode<synchronous>, transform_indices = @transform_1, window_bounds = array<i64: 8, 1>}, {pipeline_mode = #tpu.pipeline_mode<synchronous>, transform_indices = @transform_2, window_bounds = array<i64: 8, 1>}, {pipeline_mode = #tpu.pipeline_mode<synchronous>, transform_indices = @transform_3, window_bounds = array<i64: 8, 72>}, {pipeline_mode = #tpu.pipeline_mode<synchronous>, transform_indices = @transform_4, window_bounds = array<i64: 8, 1>}, {transform_indices = @transform_5, window_bounds = array<i64: 1, 8, 256>}]} {
    %c0 = arith.constant 0 : index
    %c0_0 = arith.constant 0 : index
    %c0_1 = arith.constant 0 : index
    %0 = vector.load %arg1[%c0, %c0_0, %c0_1] : memref<1x8x256xf32, #tpu.memory_space<vmem>>, vector<1x8x256xf32>
    %1 = vector.shape_cast %0 : vector<1x8x256xf32> to vector<8x256xf32>
    %c0_2 = arith.constant 0 : index
    %c0_3 = arith.constant 0 : index
    %2 = vector.load %arg2[%c0_2, %c0_3] : memref<8x1xf32, #tpu.memory_space<vmem>>, vector<8x1xf32>
    %3 = vector.broadcast %2 : vector<8x1xf32> to vector<8x256xf32>
    %4 = arith.mulf %1, %3 : vector<8x256xf32>
    %c0_4 = arith.constant 0 : index
    %c0_5 = arith.constant 0 : index
    %5 = vector.load %arg3[%c0_4, %c0_5] : memref<8x1xf32, #tpu.memory_space<vmem>>, vector<8x1xf32>
    %6 = vector.broadcast %5 : vector<8x1xf32> to vector<8x256xf32>
    %7 = arith.addf %4, %6 : vector<8x256xf32>
    %cst = arith.constant 0.000000e+00 : f32
    %8 = vector.broadcast %cst : f32 to vector<8x256xf32>
    %9 = arith.maximumf %7, %8 : vector<8x256xf32>
    %cst_6 = arith.constant 0.000000e+00 : f32
    %10 = vector.broadcast %cst_6 : f32 to vector<8x290xf32>
    %c0_7 = arith.constant 0 : index
    %c0_8 = arith.constant 0 : index
    %11 = vector.load %arg7[%c0_7, %c0_8] : memref<8x290xf32, #tpu.memory_space<vmem>>, vector<8x290xf32>
    tpu.vector_store %arg7[%c0_7, %c0_8], %10 {strides = array<i32>} : memref<8x290xf32, #tpu.memory_space<vmem>>, vector<8x290xf32>,
    %c0_9 = arith.constant 0 : index
    %c17 = arith.constant 17 : index
    %12 = vector.load %arg7[%c0_9, %c17] : memref<8x290xf32, #tpu.memory_space<vmem>>, vector<8x256xf32>
    tpu.vector_store %arg7[%c0_9, %c17], %9 {strides = array<i32>} : memref<8x290xf32, #tpu.memory_space<vmem>>, vector<8x256xf32>,
    %13 = tpu.iota {dimensions = array<i32: 1>} : vector<8x256xi32>
    %c16_i32 = arith.constant 16 : i32
    %c0_i32 = arith.constant 0 : i32
    %14 = arith.cmpi eq, %c16_i32, %c0_i32 : i32
    %c1_i32 = arith.constant 1 : i32
    %15 = arith.select %14, %c1_i32, %c16_i32 : i32
    %16 = vector.broadcast %15 : i32 to vector<8x256xi32>
    %17 = arith.remsi %13, %16 : vector<8x256xi32>
    %c0_i32_10 = arith.constant 0 : i32
    %18 = vector.broadcast %c0_i32_10 : i32 to vector<8x256xi32>
    %19 = arith.cmpi ne, %17, %18 : vector<8x256xi32>
    %c0_i32_11 = arith.constant 0 : i32
    %20 = vector.broadcast %c0_i32_11 : i32 to vector<8x256xi32>
    %21 = arith.cmpi slt, %17, %20 : vector<8x256xi32>
    %c0_i32_12 = arith.constant 0 : i32
    %22 = arith.cmpi slt, %15, %c0_i32_12 : i32
    %23 = vector.broadcast %22 : i1 to vector<8x256xi1>
    %24 = vector.broadcast %23 : vector<8x256xi1> to vector<8x256xi1>
    %25 = arith.xori %21, %24 : vector<8x256xi1>
    %26 = arith.andi %25, %19 : vector<8x256xi1>
    %27 = vector.broadcast %15 : i32 to vector<8x256xi32>
    %28 = arith.addi %17, %27 : vector<8x256xi32>
    %29 = arith.select %26, %28, %17 : vector<8x256xi1>, vector<8x256xi32>
    %c1_i32_13 = arith.constant 1 : i32
    %30 = vector.broadcast %c1_i32_13 : i32 to vector<8x256xi32>
    %31 = arith.cmpi sge, %29, %30 : vector<8x256xi32>
    %c14_i32 = arith.constant 14 : i32
    %32 = vector.broadcast %c14_i32 : i32 to vector<8x256xi32>
    %33 = arith.cmpi sle, %29, %32 : vector<8x256xi32>
    %c0_14 = arith.constant 0 : index
    %c0_15 = arith.constant 0 : index
    %34 = vector.load %arg7[%c0_14, %c0_15] : memref<8x290xf32, #tpu.memory_space<vmem>>, vector<8x256xf32>
    %cst_16 = arith.constant 0.000000e+00 : f32
    %35 = vector.broadcast %cst_16 : f32 to vector<8x256xf32>
    %36 = arith.select %31, %34, %35 : vector<8x256xi1>, vector<8x256xf32>
    %c0_17 = arith.constant 0 : index
    %c0_18 = arith.constant 0 : index
    %37 = vector.load %arg8[%c0_17, %c0_18] : memref<72x256xf32, #tpu.memory_space<vmem>>, vector<8x256xf32>
    tpu.vector_store %arg8[%c0_17, %c0_18], %36 {strides = array<i32>} : memref<72x256xf32, #tpu.memory_space<vmem>>, vector<8x256xf32>,
    %c0_19 = arith.constant 0 : index
    %c1 = arith.constant 1 : index
    %38 = vector.load %arg7[%c0_19, %c1] : memref<8x290xf32, #tpu.memory_space<vmem>>, vector<8x256xf32>
    %c8 = arith.constant 8 : index
    %c0_20 = arith.constant 0 : index
    %39 = vector.load %arg8[%c8, %c0_20] : memref<72x256xf32, #tpu.memory_space<vmem>>, vector<8x256xf32>
    tpu.vector_store %arg8[%c8, %c0_20], %38 {strides = array<i32>} : memref<72x256xf32, #tpu.memory_space<vmem>>, vector<8x256xf32>,
    %c0_21 = arith.constant 0 : index
    %c2 = arith.constant 2 : index
    %40 = vector.load %arg7[%c0_21, %c2] : memref<8x290xf32, #tpu.memory_space<vmem>>, vector<8x256xf32>
    %cst_22 = arith.constant 0.000000e+00 : f32
    %41 = vector.broadcast %cst_22 : f32 to vector<8x256xf32>
    %42 = arith.select %33, %40, %41 : vector<8x256xi1>, vector<8x256xf32>
    %c16 = arith.constant 16 : index
    %c0_23 = arith.constant 0 : index
    %43 = vector.load %arg8[%c16, %c0_23] : memref<72x256xf32, #tpu.memory_space<vmem>>, vector<8x256xf32>
    tpu.vector_store %arg8[%c16, %c0_23], %42 {strides = array<i32>} : memref<72x256xf32, #tpu.memory_space<vmem>>, vector<8x256xf32>,
    %c0_24 = arith.constant 0 : index
    %c16_25 = arith.constant 16 : index
    %44 = vector.load %arg7[%c0_24, %c16_25] : memref<8x290xf32, #tpu.memory_space<vmem>>, vector<8x256xf32>
    %cst_26 = arith.constant 0.000000e+00 : f32
    %45 = vector.broadcast %cst_26 : f32 to vector<8x256xf32>
    %46 = arith.select %31, %44, %45 : vector<8x256xi1>, vector<8x256xf32>
    %c24 = arith.constant 24 : index
    %c0_27 = arith.constant 0 : index
    %47 = vector.load %arg8[%c24, %c0_27] : memref<72x256xf32, #tpu.memory_space<vmem>>, vector<8x256xf32>
    tpu.vector_store %arg8[%c24, %c0_27], %46 {strides = array<i32>} : memref<72x256xf32, #tpu.memory_space<vmem>>, vector<8x256xf32>,
    %c0_28 = arith.constant 0 : index
    %c17_29 = arith.constant 17 : index
    %48 = vector.load %arg7[%c0_28, %c17_29] : memref<8x290xf32, #tpu.memory_space<vmem>>, vector<8x256xf32>
    %c32 = arith.constant 32 : index
    %c0_30 = arith.constant 0 : index
    %49 = vector.load %arg8[%c32, %c0_30] : memref<72x256xf32, #tpu.memory_space<vmem>>, vector<8x256xf32>
    tpu.vector_store %arg8[%c32, %c0_30], %48 {strides = array<i32>} : memref<72x256xf32, #tpu.memory_space<vmem>>, vector<8x256xf32>,
    %c0_31 = arith.constant 0 : index
    %c18 = arith.constant 18 : index
    %50 = vector.load %arg7[%c0_31, %c18] : memref<8x290xf32, #tpu.memory_space<vmem>>, vector<8x256xf32>
    %cst_32 = arith.constant 0.000000e+00 : f32
    %51 = vector.broadcast %cst_32 : f32 to vector<8x256xf32>
    %52 = arith.select %33, %50, %51 : vector<8x256xi1>, vector<8x256xf32>
    %c40 = arith.constant 40 : index
    %c0_33 = arith.constant 0 : index
    %53 = vector.load %arg8[%c40, %c0_33] : memref<72x256xf32, #tpu.memory_space<vmem>>, vector<8x256xf32>
    tpu.vector_store %arg8[%c40, %c0_33], %52 {strides = array<i32>} : memref<72x256xf32, #tpu.memory_space<vmem>>, vector<8x256xf32>,
    %c0_34 = arith.constant 0 : index
    %c32_35 = arith.constant 32 : index
    %54 = vector.load %arg7[%c0_34, %c32_35] : memref<8x290xf32, #tpu.memory_space<vmem>>, vector<8x256xf32>
    %cst_36 = arith.constant 0.000000e+00 : f32
    %55 = vector.broadcast %cst_36 : f32 to vector<8x256xf32>
    %56 = arith.select %31, %54, %55 : vector<8x256xi1>, vector<8x256xf32>
    %c48 = arith.constant 48 : index
    %c0_37 = arith.constant 0 : index
    %57 = vector.load %arg8[%c48, %c0_37] : memref<72x256xf32, #tpu.memory_space<vmem>>, vector<8x256xf32>
    tpu.vector_store %arg8[%c48, %c0_37], %56 {strides = array<i32>} : memref<72x256xf32, #tpu.memory_space<vmem>>, vector<8x256xf32>,
    %c0_38 = arith.constant 0 : index
    %c33 = arith.constant 33 : index
    %58 = vector.load %arg7[%c0_38, %c33] : memref<8x290xf32, #tpu.memory_space<vmem>>, vector<8x256xf32>
    %c56 = arith.constant 56 : index
    %c0_39 = arith.constant 0 : index
    %59 = vector.load %arg8[%c56, %c0_39] : memref<72x256xf32, #tpu.memory_space<vmem>>, vector<8x256xf32>
    tpu.vector_store %arg8[%c56, %c0_39], %58 {strides = array<i32>} : memref<72x256xf32, #tpu.memory_space<vmem>>, vector<8x256xf32>,
    %c0_40 = arith.constant 0 : index
    %c34 = arith.constant 34 : index
    %60 = vector.load %arg7[%c0_40, %c34] : memref<8x290xf32, #tpu.memory_space<vmem>>, vector<8x256xf32>
    %cst_41 = arith.constant 0.000000e+00 : f32
    %61 = vector.broadcast %cst_41 : f32 to vector<8x256xf32>
    %62 = arith.select %33, %60, %61 : vector<8x256xi1>, vector<8x256xf32>
    %c64 = arith.constant 64 : index
    %c0_42 = arith.constant 0 : index
    %63 = vector.load %arg8[%c64, %c0_42] : memref<72x256xf32, #tpu.memory_space<vmem>>, vector<8x256xf32>
    tpu.vector_store %arg8[%c64, %c0_42], %62 {strides = array<i32>} : memref<72x256xf32, #tpu.memory_space<vmem>>, vector<8x256xf32>,
    %c0_43 = arith.constant 0 : index
    %c0_44 = arith.constant 0 : index
    %64 = vector.load %arg4[%c0_43, %c0_44] : memref<8x72xf32, #tpu.memory_space<vmem>>, vector<8x72xf32>
    %c0_45 = arith.constant 0 : index
    %c0_46 = arith.constant 0 : index
    %65 = vector.load %arg8[%c0_45, %c0_46] : memref<72x256xf32, #tpu.memory_space<vmem>>, vector<72x256xf32>
    %cst_47 = arith.constant dense<0.000000e+00> : vector<8x256xf32>
    %66 = tpu.matmul %64, %65, %cst_47 {dimension_numbers = #tpu.dot_dimension_numbers<[1], [0], [0], [1], [0, 0, 1, 1], [], []>} : vector<8x72xf32>, vector<72x256xf32>, vector<8x256xf32> -> vector<8x256xf32>
    %c0_48 = arith.constant 0 : index
    %c0_49 = arith.constant 0 : index
    %67 = vector.load %arg5[%c0_48, %c0_49] : memref<8x1xf32, #tpu.memory_space<vmem>>, vector<8x1xf32>
    %68 = vector.broadcast %67 : vector<8x1xf32> to vector<8x256xf32>
    %69 = arith.addf %66, %68 : vector<8x256xf32>
    %cst_50 = arith.constant 0.000000e+00 : f32
    %70 = vector.broadcast %cst_50 : f32 to vector<8x256xf32>
    %71 = arith.maximumf %69, %70 : vector<8x256xf32>
    %c0_51 = arith.constant 0 : index
    %c0_52 = arith.constant 0 : index
    %c0_53 = arith.constant 0 : index
    %72 = vector.load %arg6[%c0_51, %c0_52, %c0_53] : memref<1x8x256xf32, #tpu.memory_space<vmem>>, vector<1x8x256xf32>
    %73 = vector.shape_cast %72 : vector<1x8x256xf32> to vector<8x256xf32>
    %74 = vector.shape_cast %71 : vector<8x256xf32> to vector<1x8x256xf32>
    tpu.vector_store %arg6[%c0_51, %c0_52, %c0_53], %74 {strides = array<i32>} : memref<1x8x256xf32, #tpu.memory_space<vmem>>, vector<1x8x256xf32>,
    return
  }
  func.func @transform_0(%arg0: i32) -> (i32, i32, i32) {
    %c0_i32 = arith.constant 0 : i32
    %c0_i32_0 = arith.constant 0 : i32
    %c0_i32_1 = arith.constant 0 : i32
    return %arg0, %c0_i32, %c0_i32_0 : i32, i32, i32
  }
  func.func @transform_1(%arg0: i32) -> (i32, i32) {
    %c0_i32 = arith.constant 0 : i32
    %c0_i32_0 = arith.constant 0 : i32
    %c0_i32_1 = arith.constant 0 : i32
    return %c0_i32, %c0_i32_0 : i32, i32
  }
  func.func @transform_2(%arg0: i32) -> (i32, i32) {
    %c0_i32 = arith.constant 0 : i32
    %c0_i32_0 = arith.constant 0 : i32
    %c0_i32_1 = arith.constant 0 : i32
    return %c0_i32, %c0_i32_0 : i32, i32
  }
  func.func @transform_3(%arg0: i32) -> (i32, i32) {
    %c0_i32 = arith.constant 0 : i32
    %c0_i32_0 = arith.constant 0 : i32
    %c0_i32_1 = arith.constant 0 : i32
    return %c0_i32, %c0_i32_0 : i32, i32
  }
  func.func @transform_4(%arg0: i32) -> (i32, i32) {
    %c0_i32 = arith.constant 0 : i32
    %c0_i32_0 = arith.constant 0 : i32
    %c0_i32_1 = arith.constant 0 : i32
    return %c0_i32, %c0_i32_0 : i32, i32
  }
  func.func @transform_5(%arg0: i32) -> (i32, i32, i32) {
    %c0_i32 = arith.constant 0 : i32
    %c0_i32_0 = arith.constant 0 : i32
    %c0_i32_1 = arith.constant 0 : i32
    return %arg0, %c0_i32, %c0_i32_0 : i32, i32, i32
  }
}

</mosaic_0001>

<bundles_post_ra>
// kernel: conv_block_forward.2
= control target key start
LH: loop header
LB: loop body
LE: loop exit
PB: predicated region body
PF: predicated region fallthrough
CT: control target
= control target key end

     0   :  { %s761_s15 = smov 0   ;;  %s870_s0 = inlined_call_operand.vmem [shape: f32[2,4,256], index: 0, kind: input, shape index: {}]   ;;  %s871_s1 = inlined_call_operand.vmem [shape: f32[8,36], index: 1, kind: input, shape index: {}]   ;;  %s872_s2 = inlined_call_operand.vmem [shape: f32[2,8,256], index: 2, kind: output, shape index: {0}]   ;;  %s873_s3 = inlined_call_operand.vmem [shape: f32[2,8,1], index: 3, kind: output, shape index: {1}]   ;;  %s874_s4 = inlined_call_operand.vmem [shape: f32[2,8,1], index: 4, kind: output, shape index: {2}]  }
   0x1 LB: > { %s670_s16 = sadd.s32 4294967295, %s724_s15   ;;  %p674_p0 = scmp.ge.s32.totalorder %s724_s15, 1  ;;  %s724_s15 = sphi %s761_s15, %s15_s15  }
   0x2   : > { %p167_p1 = scmp.lt.s32.totalorder %s724_s15, 3 }
   0x4   : > { %p168_p2 = pnand %p674_p0, %p167_p1 }
   0x5   : > { %p201_p3 = scmp.lt.s32.totalorder (!%p168_p2), %s670_s16, 1  ;;  %vm221_vm0 = vcmask (!%p168_p2), 273408   ;;  %v726_v0 = vmov (!%p168_p2), 0.0   ;;  %s727_s21 = smov (!%p168_p2), 17   ;;  %v237_v2 = vlaneseq (!%p168_p2)  ;;  %vm231_vm1 = vcmask (!%p168_p2), 1043592  }
   0x6   : > { %171 = sbr.rel (%p168_p2) target bundleno = 822 (0x336), region = 28  ;;  %220 = vst [vmem:[#allocation2] sm:$0xff] (!%p168_p2), %v726_v0  ;;  %222 = vst.msk [vmem:[#allocation2 + $0x8] sm:$0xf] (!%p168_p2), %vm221_vm0, %v726_v0  ;;  %530 = vmatprep.mubr.f32.mxu0 (!%p168_p2), %v726_v0  ;;  %vm232_vm2 = vcmask (!%p168_p2), 1047556   ;;  %vm227_vm3 = vcmask (!%p168_p2), 138240  }
   0x7   : > { %v778_v3 = vand.u32 (!%p168_p2), 127, %v237_v2  ;;  %vm235_vm4 = vcmask (!%p168_p2), 134144   ;;  %vm233_vm5 = vmor (!%p168_p2), %vm232_vm2, %vm231_vm1  ;;  %s728_s22 = smov (!%p168_p2), 96   ;;  %s729_s23 = smov (!%p168_p2), 112   ;;  %vm288_vm8 = vcmask (!%p168_p2), 1039360   ;;  %vm417_vm9 = vcmask (!%p168_p2), 777216  }
   0x8   : > { %s730_s24 = smov (!%p168_p2), 111   ;;  %s731_s25 = smov (!%p168_p2), 126   ;;  %vm326_vm10 = vcmask (!%p168_p2), 916480   ;;  %vm306_vm11 = vcmask (!%p168_p2), 1031168   ;;  %vm370_vm14 = vcmask (!%p168_p2), 900096   ;;  %vm396_vm15 = vcmask (!%p168_p2), 785408  }
   0x9   : > { %v781_v7 = vadd.s32 (!%p168_p2), 128, %v778_v3  ;;  %v244_v8 = vand.u32 (!%p168_p2), 15, %v778_v3  ;;  %s732_s26 = smov (!%p168_p2), 110   ;;  %s733_s27 = smov (!%p168_p2), 127   ;;  %vm352_vm0 = vcmask (!%p168_p2), 908288   ;;  %vm435_vm1 = vcmask (!%p168_p2), 769024  }
   0xa   : > { %s734_s28 = smov (!%p168_p2), 95   ;;  %s735_s29 = smov (!%p168_p2), 94   ;;  %vm459_vm2 = vcmask (!%p168_p2), 1043456  }
   0xb   : > { %v251_v9 = vand.u32 (!%p168_p2), 15, %v781_v7  ;;  %vm787_vm6 = vcmp.ge.s32.totalorder (!%p168_p2), %v244_v8, 1  ;;  %vm820_vm12 = vcmp.le.s32.totalorder (!%p168_p2), %v244_v8, 14 }
   0xd   : > { %s884_s16 = smov (!%p201_p3, %s670_s16), 1  ;;  %vm795_vm7 = vcmp.ge.s32.totalorder %v251_v9, 1  ;;  %vm826_vm13 = vcmp.le.s32.totalorder %v251_v9, 14 }
   0xe   : > { %s772_s17 = sshll.u32 %s884_s16, 3  ;;  %s687_s6 = sshll.u32 %s884_s16, 4 }
   0xf   : > { %s205_s20 = scalar_lea.vmem %s870_s0, %s772_s17  ;;  %s210_s9 = scalar_lea.vmem %s872_s2, %s687_s6 }
  0x10   : > { %v219_v1 = vld [vmem:[%s205_s20] sm:$0xff]  ;;  %s214_s12 = scalar_lea.vmem %s873_s3, %s772_s17  ;;  %s218_s16 = scalar_lea.vmem %s874_s4, %s772_s17 }
  0x11   : > { %224 = vrot.lane.b32.xlu0 %v219_v1, %s727_s21 }
  0x83   : > { %v225_v4 = vpop.permute.xlu0 %224 }
  0x84   : > { %v226_v5 = vrot.slane %v225_v4, 4 }
  0x86   : > { %v228_v6 = vsel %vm227_vm3, %v226_v5, %v225_v4  ;;  %236 = vst.msk [vmem:[#allocation2 + $0x8] sm:$0xf] %vm235_vm4, %v226_v5  ;;  %vm455_vm3 = vcmask 293888   ;;  %vm545_vm4 = vcmask 7168  }
  0x87   : > { %234 = vst.msk [vmem:[#allocation2] sm:$0xff] %vm233_vm5, %v228_v6 }
  0x8d   : > { %v386_v10 = vld [vmem:[#allocation2 + $0x8] sm:$0xf] }
  0x8e   : > { %v316_v11 = vld [vmem:[#allocation2 + $0x8] sm:$0xf]  ;;  %394 = vrot.lane.b32.xlu0 %v386_v10, %s728_s22  ;;  %v276_v13 = vld [vmem:[#allocation2] sm:$0xff] }
  0x8f   : > { %324 = vrot.lane.b32.xlu1 %v316_v11, %s729_s23  ;;  %v319_v15 = vcombine.high %v276_v13, %v276_v13  ;;  %v272_v16 = vsel %vm787_vm6, %v276_v13, 0.0  ;;  %v342_v17 = vld [vmem:[#allocation2 + $0x8] sm:$0xf]  ;;  %v280_v23 = vcombine.low %v276_v13, %v276_v13 }
  0x90   : > { %v296_v18 = vld [vmem:[#allocation2 + $0x8] sm:$0xf]  ;;  %274 = vst [vmem:[#allocation3] sm:$0xf] %v272_v16 }
  0x91   : > { %v273_v19 = vsel %vm795_vm7, %v319_v15, 0.0  ;;  %v360_v20 = vld [vmem:[#allocation2 + $0x8] sm:$0xf] }
  0x92   : > { %350 = vrot.lane.b32.xlu0 %v342_v17, %s730_s24  ;;  %275 = vst [vmem:[#allocation3 + $0x8] sm:$0xf] %v273_v19  ;;  %v716_v21 = vld [vmem:[#allocation2 + $0x8] ss:$0 sps:$4 sm:$0xff]  }
  0x93   : > { %304 = vrot.lane.b32.xlu1 %v296_v18, %s731_s25  ;;  %v717_v22 = vld [vmem:[#allocation2 + $0x8] ss:$0 sps:$4 sm:$0xff]  }
  0x94   : > { %v425_v24 = vld [vmem:[#allocation2 + $0x8] sm:$0xf] }
  0x96   : > { %284 = vrot.lane.b32.xlu0 %v276_v13, %s733_s27 }
  0x97   : > { %368 = vrot.lane.b32.xlu1 %v360_v20, %s732_s26 }
  0x9a   : > { %300 = vrot.lane.b32.xlu0 %v276_v13, %s731_s25 }
  0x9b   : > { %320 = vrot.lane.b32.xlu1 %v276_v13, %s729_s23 }
  0x9e   : > { %364 = vrot.lane.b32.xlu0 %v276_v13, %s732_s26 }
  0x9f   : > { %390 = vrot.lane.b32.xlu1 %v276_v13, %s728_s22 }
  0xa2   : > { %413 = vrot.lane.b32.xlu0 %v276_v13, %s734_s28 }
  0xa3   : > { %286 = vrot.lane.b32.xlu1 %v716_v21, %s733_s27 }
  0xa6   : > { %322 = vrot.lane.b32.xlu0 %v319_v15, %s729_s23 }
  0xa7   : > { %415 = vrot.lane.b32.xlu1 %v717_v22, %s734_s28 }
  0xaa   : > { %302 = vrot.lane.b32.xlu0 %v319_v15, %s731_s25 }
  0xab   : > { %282 = vrot.lane.b32.xlu1 %v280_v23, %s733_s27 }
  0xae   : > { %366 = vrot.lane.b32.xlu0 %v319_v15, %s732_s26 }
  0xaf   : > { %392 = vrot.lane.b32.xlu1 %v319_v15, %s728_s22 }
  0xb2   : > { %346 = vrot.lane.b32.xlu0 %v276_v13, %s730_s24 }
  0xb3   : > { %348 = vrot.lane.b32.xlu1 %v319_v15, %s730_s24 }
  0xb6   : > { %431 = vrot.lane.b32.xlu0 %v319_v15, %s735_s29 }
  0xb7   : > { %411 = vrot.lane.b32.xlu1 %v280_v23, %s734_s28 }
  0xba   : > { %429 = vrot.lane.b32.xlu0 %v276_v13, %s735_s29 }
  0xbb   : > { %433 = vrot.lane.b32.xlu1 %v425_v24, %s735_s29 }
 0x100   : > { %v395_v25 = vpop.permute.xlu0 %394 }
 0x101   : > { %v325_v26 = vpop.permute.xlu1 %324 }
 0x104   : > { %v807_v27 = vpop.permute.xlu0 %350 }
 0x105   : > { %v305_v28 = vpop.permute.xlu1 %304 }
 0x108   : > { %v285_v30 = vpop.permute.xlu0 %284 }
 0x109   : > { %v369_v29 = vpop.permute.xlu1 %368 }
 0x10c   : > { %v301_v32 = vpop.permute.xlu0 %300 }
 0x10d   : > { %v321_v31 = vpop.permute.xlu1 %320 }
 0x110   : > { %v365_v34 = vpop.permute.xlu0 %364 }
 0x111   : > { %v391_v33 = vpop.permute.xlu1 %390 }
 0x114   : > { %v809_v36 = vpop.permute.xlu0 %413 }
 0x115   : > { %v287_v35 = vpop.permute.xlu1 %286 }
 0x116   : > { %v290_v37 = vsel %vm288_vm8, %v285_v30, %v287_v35 }
 0x117   : > { %294 = vst [vmem:[#allocation3 + $0x8] sm:$0xf0] %v290_v37 }
 0x118   : > { %v323_v39 = vpop.permute.xlu0 %322 }
 0x119   : > { %v416_v38 = vpop.permute.xlu1 %415  ;;  %v327_v41 = vsel %vm326_vm10, %v321_v31, %v323_v39  ;;  %v328_v42 = vsel %vm326_vm10, %v323_v39, %v325_v26  ;;  %v444_v31 = vld [vmem:[%s871_s1] sm:$0xff] }
 0x11a   : > { %v419_v40 = vsel %vm417_vm9, %v809_v36, %v416_v38  ;;  %v331_v43 = vsel %vm787_vm6, %v327_v41, 0.0  ;;  %v332_v44 = vsel %vm795_vm7, %v328_v42, 0.0 }
 0x11b   : > { %423 = vst [vmem:[#allocation3 + $0x38] sm:$0xf0] %v419_v40  ;;  %v335_v45 = vrot.slane %v331_v43, 4  ;;  %v336_v46 = vrot.slane %v332_v44, 4 }
 0x11c   : > { %v303_v49 = vpop.permute.xlu0 %302 }
 0x11d   : > { %v283_v50 = vpop.permute.xlu1 %282  ;;  %339 = vst [vmem:[#allocation3 + $0x10] sm:$0xf0] %v335_v45  ;;  %340 = vst [vmem:[#allocation3 + $0x18] sm:$0xf0] %v336_v46  ;;  %v307_v51 = vsel %vm306_vm11, %v301_v32, %v303_v49  ;;  %v308_v52 = vsel %vm306_vm11, %v303_v49, %v305_v28 }
 0x11e   : > { %v289_v53 = vsel %vm288_vm8, %v283_v50, %v285_v30  ;;  %v311_v54 = vsel %vm820_vm12, %v307_v51, 0.0  ;;  %v312_v55 = vsel %vm826_vm13, %v308_v52, 0.0  ;;  %v446_v9 = vld [vmem:[#allocation3 + $0x8] sm:$0xff] }
 0x11f   : > { %293 = vst [vmem:[#allocation3] sm:$0xf0] %v289_v53  ;;  %313 = vst [vmem:[#allocation3 + $0x10] sm:$0xf] %v311_v54 }
 0x120   : > { %314 = vst [vmem:[#allocation3 + $0x18] sm:$0xf] %v312_v55  ;;  %v367_v56 = vpop.permute.xlu0 %366 }
 0x121   : > { %v393_v57 = vpop.permute.xlu1 %392  ;;  %v371_v58 = vsel %vm370_vm14, %v365_v34, %v367_v56  ;;  %v372_v59 = vsel %vm370_vm14, %v367_v56, %v369_v29 }
 0x122   : > { %v397_v60 = vsel %vm396_vm15, %v391_v33, %v393_v57  ;;  %v398_v61 = vsel %vm396_vm15, %v393_v57, %v395_v25  ;;  %v375_v62 = vsel %vm820_vm12, %v371_v58, 0.0  ;;  %v376_v63 = vsel %vm826_vm13, %v372_v59, 0.0 }
 0x123   : > { %v401_v0 = vsel %vm787_vm6, %v397_v60, 0.0  ;;  %v402_v1 = vsel %vm795_vm7, %v398_v61, 0.0  ;;  %v379_v2 = vrot.slane %v375_v62, 4  ;;  %v380_v3 = vrot.slane %v376_v63, 4 }
 0x124   : > { %403 = vst [vmem:[#allocation3 + $0x30] sm:$0xf] %v401_v0  ;;  %404 = vst [vmem:[#allocation3 + $0x38] sm:$0xf] %v402_v1  ;;  %v347_v4 = vpop.permute.xlu0 %346 }
 0x125   : > { %v349_v5 = vpop.permute.xlu1 %348  ;;  %383 = vst [vmem:[#allocation3 + $0x20] sm:$0xf0] %v379_v2  ;;  %384 = vst [vmem:[#allocation3 + $0x28] sm:$0xf0] %v380_v3 }
 0x126   : > { %v353_v6 = vsel %vm352_vm0, %v347_v4, %v349_v5  ;;  %v354_v7 = vsel %vm352_vm0, %v349_v5, %v807_v27  ;;  %v445_v8 = vld [vmem:[#allocation3] sm:$0xff]  ;;  %v447_v11 = vld [vmem:[#allocation3 + $0x10] sm:$0xff] }
 0x127   : > { %357 = vst [vmem:[#allocation3 + $0x20] sm:$0xf] %v353_v6  ;;  %358 = vst [vmem:[#allocation3 + $0x28] sm:$0xf] %v354_v7  ;;  %v448_v10 = vld [vmem:[#allocation3 + $0x18] sm:$0xff]  ;;  %v690_v13 = vpack.c.bf16 %v447_v11, %v445_v8 }
 0x128   : > { %v688_v12 = vpack.c.bf16 %v448_v10, %v446_v9  ;;  %v432_v14 = vpop.permute.xlu0 %431 }
 0x129   : > { %v412_v15 = vpop.permute.xlu1 %411 }
 0x12a   : > { %v418_v16 = vsel %vm417_vm9, %v412_v15, %v809_v36  ;;  %689 = vmatprep.subr.bf16.mxu0 %v688_v12 }
 0x12b   : > { %422 = vst [vmem:[#allocation3 + $0x30] sm:$0xf0] %v418_v16  ;;  %691 = vmatpush1.bf16.msra.mxu0 %v690_v13  ;;  %v452_v22 = vld [vmem:[#allocation3 + $0x38] sm:$0xff] }
 0x12c   : > { %v430_v17 = vpop.permute.xlu0 %429 }
 0x12d   : > { %v434_v18 = vpop.permute.xlu1 %433  ;;  %v436_v19 = vsel %vm435_vm1, %v430_v17, %v432_v14 }
 0x12e   : > { %v437_v20 = vsel %vm435_vm1, %v432_v14, %v434_v18  ;;  %v450_v21 = vld [vmem:[#allocation3 + $0x28] sm:$0xff]  ;;  %v440_v23 = vsel %vm820_vm12, %v436_v19, 0.0  ;;  %v449_v26 = vld [vmem:[#allocation3 + $0x20] sm:$0xff] }
 0x12f   : > { %v441_v24 = vsel %vm826_vm13, %v437_v20, 0.0  ;;  %v692_v25 = vpack.c.bf16 %v452_v22, %v450_v21  ;;  %442 = vst [vmem:[#allocation3 + $0x40] sm:$0xf] %v440_v23 }
 0x130   : > { %443 = vst [vmem:[#allocation3 + $0x48] sm:$0xf] %v441_v24 }
 0x131   : > { %693 = vmatprep.subr.bf16.mxu0 %v692_v25 }
 0x132   : > { %v451_v27 = vld [vmem:[#allocation3 + $0x30] sm:$0xff] }
 0x133   : > { %v694_v28 = vpack.c.bf16 %v451_v27, %v449_v26 }
 0x135   : > { %695 = vmatpush1.bf16.msra.mxu0 %v694_v28 }
 0x136   : > { %v453_v30 = vld [vmem:[#allocation3 + $0x40] sm:$0xf] }
 0x137   : > { %v454_v29 = vld [vmem:[#allocation3 + $0x48] sm:$0xf] }
 0x138   : > { %681 = vmatprep.subr.msk.mxu0 %vm459_vm2, %v454_v29 }
 0x139   : > { %682 = vmatpush1.msk.msra.mxu0 %vm459_vm2, %v453_v30 }
 0x13a   : > { %683 = vmatmul.mubr.msk.f32.vlgmr.msra.gmra.mrb[0].mxu0 %vm455_vm3, %v444_v31 }
 0x20d   : > { %v532_v32 = vpop.f32.mrb[0].mxu0 }
 0x20e   : > { %v534_v33 = vpop.f32.mrb[1].mxu0  ;;  %537 = vst [vmem:[%s210_s9] sm:$0xff] %v532_v32 }
 0x20f   : > { %538 = vst [vmem:[%s210_s9 + $0x8] sm:$0xff] %v534_v33  ;;  %v539_v34 = vadd.f32 %v534_v33, %v532_v32 }
 0x211   : > { %540 = vadd.xlane.f32.xlu1 %v539_v34 }
 0x29e   : > { %v541_v35 = vpop.xlane.xlu1 %540 }
 0x29f   : > { %v542_v36 = vmul.f32 0.00390625, %v541_v35  ;;  %546 = vst.msk [vmem:[%s214_s12] sm:$0xff] %vm545_vm4, %v541_v35 }
 0x2a1   : > { %v543_v37 = vsub.f32 %v532_v32, %v542_v36  ;;  %v544_v38 = vsub.f32 %v534_v33, %v542_v36 }
 0x2a3   : > { %v547_v39 = vmul.f32 %v543_v37, %v543_v37  ;;  %v548_v40 = vmul.f32 %v544_v38, %v544_v38 }
 0x2a5   : > { %v549_v41 = vadd.f32 %v548_v40, %v547_v39 }
 0x2a7   : > { %550 = vadd.xlane.f32.xlu0 %v549_v41 }
 0x334   : > { %v551_v42 = vpop.xlane.xlu0 %550 }
 0x335   : > { %552 = vst.msk [vmem:[%s218_s16] sm:$0xff] %vm545_vm4, %v551_v42 }
 0x336 PF: > { %s15_s15 = sadd.s32 1, %s724_s15  }
 0x337   : > { %p12_p4 = scmp.ge.s32.totalorder %s15_s15, 4  }
 0x339   :  { %14 = sbr.rel (!%p12_p4) target bundleno = 1 (0x1), region = 82 }

// kernel: conv_block_forward.3
= control target key start
LH: loop header
LB: loop body
LE: loop exit
PB: predicated region body
PF: predicated region fallthrough
CT: control target
= control target key end

     0   :  { %s779_s18 = smov 0   ;;  %s896_s0 = inlined_call_operand.vmem [shape: f32[2,8,256], index: 0, kind: input, shape index: {}]   ;;  %s897_s1 = inlined_call_operand.vmem [shape: f32[8,1], index: 1, kind: input, shape index: {}]   ;;  %s898_s2 = inlined_call_operand.vmem [shape: f32[8,1], index: 2, kind: input, shape index: {}]   ;;  %s899_s3 = inlined_call_operand.vmem [shape: f32[8,72], index: 3, kind: input, shape index: {}]   ;;  %s900_s4 = inlined_call_operand.vmem [shape: f32[8,1], index: 4, kind: input, shape index: {}]   ;;  %s901_s5 = inlined_call_operand.vmem [shape: f32[2,8,256], index: 5, kind: output, shape index: {}]  }
   0x1 LB: > { %s622_s19 = sadd.s32 4294967295, %s735_s18   ;;  %p626_p0 = scmp.ge.s32.totalorder %s735_s18, 1  ;;  %s735_s18 = sphi %s779_s18, %s15_s18  }
   0x2   : > { %p187_p1 = scmp.lt.s32.totalorder %s735_s18, 3 }
   0x4   : > { %p188_p2 = pnand %p626_p0, %p187_p1 }
   0x5   : > { %v227_v0 = vld [vmem:[%s897_s1] sm:$0xff] (!%p188_p2)  ;;  %v737_v1 = vmov (!%p188_p2), 0   ;;  %v738_v3 = vmov (!%p188_p2), 0.0   ;;  %p215_p3 = scmp.lt.s32.totalorder (!%p188_p2), %s622_s19, 1  ;;  %vm247_vm0 = vcmask (!%p188_p2), 277504   ;;  %s739_s28 = smov (!%p188_p2), 17   ;;  %v264_v21 = vlaneseq (!%p188_p2) }
   0x6   : > { %191 = sbr.rel (%p188_p2) target bundleno = 634 (0x27a), region = 40  ;;  %692 = vset.pattern.permute.xlu0 (!%p188_p2), %v737_v1  ;;  %728 = vset.pattern.permute.xlu1 (!%p188_p2), %v737_v1  ;;  %v235_v2 = vld [vmem:[%s898_s2] sm:$0xff] (!%p188_p2)  ;;  %245 = vst [vmem:[#allocation2] sm:$0xff] (!%p188_p2), %v738_v3  ;;  %248 = vst.msk [vmem:[#allocation2 + $0x10] sm:$0xff] (!%p188_p2), %vm247_vm0, %v738_v3  ;;  %vm260_vm1 = vcmask (!%p188_p2), 1047688   ;;  %vm255_vm2 = vcmask (!%p188_p2), 138240  }
   0x7   : > { %230 = vperm.xlu0 (!%p188_p2), %692, %v227_v0   ;;  %556 = vmatprep.mubr.f32.mxu0 (!%p188_p2), %v738_v3  ;;  %s740_s29 = smov (!%p188_p2), 126   ;;  %s741_s30 = smov (!%p188_p2), 127   ;;  %v482_v20 = vld [vmem:[%s900_s4] sm:$0xff] (!%p188_p2)  ;;  %v265_v24 = vand.u32 (!%p188_p2), 127, %v264_v21  ;;  %vm313_vm4 = vcmask (!%p188_p2), 1039360   ;;  %vm353_vm6 = vcmask (!%p188_p2), 916480  }
   0x8   : > { %s742_s6 = smov (!%p188_p2), 111   ;;  %s743_s7 = smov (!%p188_p2), 112   ;;  %vm748_vm7 = vmmov (!%p188_p2), 1   ;;  %vm332_vm9 = vcmask (!%p188_p2), 1031168   ;;  %vm393_vm13 = vcmask (!%p188_p2), 900096   ;;  %vm374_vm15 = vcmask (!%p188_p2), 908288  }
   0x9   : > { %s744_s8 = smov (!%p188_p2), 96   ;;  %s745_s9 = smov (!%p188_p2), 110   ;;  %v266_v27 = vadd.s32 (!%p188_p2), 128, %v265_v24  ;;  %v271_v31 = vand.u32 (!%p188_p2), 15, %v265_v24 }
   0xa   : > { %s746_s10 = smov (!%p188_p2), 95   ;;  %s747_s11 = smov (!%p188_p2), 94  }
   0xb   : > { %238 = vperm.xlu0 (!%p188_p2), %692, %v235_v2   ;;  %v278_v30 = vand.u32 (!%p188_p2), 15, %v266_v27  ;;  %vm824_vm5 = vcmp.ge.s32.totalorder (!%p188_p2), %v271_v31, 1  ;;  %vm848_vm12 = vcmp.le.s32.totalorder (!%p188_p2), %v271_v31, 14 }
   0xc   : > { %vm844_vm11 = vmpackc.low (!%p188_p2), %vm748_vm7, %vm824_vm5 }
   0xd   : > { %s915_s19 = smov (!%p215_p3, %s622_s19), 1  ;;  %vm820_vm3 = vcmp.ge.s32.totalorder %v278_v30, 1  ;;  %vm835_vm10 = vcmp.le.s32.totalorder %v278_v30, 14  ;;  %vm658_vm0 = vmpackc.low %vm824_vm5, %vm848_vm12  ;;  %vm454_vm5 = vcmask 769024  }
   0xe   : > { %s634_s24 = sshll.u32 %s915_s19, 4  ;;  %vm831_vm8 = vmpackc.low %vm748_vm7, %vm820_vm3 }
   0xf   : > { %s219_s27 = scalar_lea.vmem %s896_s0, %s634_s24  ;;  %vm655_vm14 = vmpackc.low %vm820_vm3, %vm835_vm10  ;;  %vm435_vm3 = vcmask 777216   ;;  %s224_s20 = scalar_lea.vmem %s901_s5, %s634_s24 }
  0x10   : > { %v225_v5 = vld [vmem:[%s219_s27] sm:$0xff]  ;;  %v226_v6 = vld [vmem:[%s219_s27 + $0x8] sm:$0xff] }
  0x86   : > { %v231_v4 = vpop.permute.xlu0 %230 }
  0x87   : > { %v233_v7 = vmul.f32 %v231_v4, %v225_v5  ;;  %v234_v9 = vmul.f32 %v231_v4, %v226_v6 }
  0x8a   : > { %v239_v8 = vpop.permute.xlu0 %238 }
  0x8b   : > { %v241_v10 = vadd.f32 %v239_v8, %v233_v7  ;;  %v242_v11 = vadd.f32 %v239_v8, %v234_v9 }
  0x8d   : > { %v243_v12 = vmax.f32 %v241_v10, 0.0  ;;  %v244_v13 = vmax.f32 %v242_v11, 0.0 }
  0x8f   : > { %251 = vrot.lane.b32.xlu1 %v243_v12, %s739_s28 }
  0x93   : > { %253 = vrot.lane.b32.xlu1 %v244_v13, %s739_s28 }
 0x101   : > { %v252_v14 = vpop.permute.xlu1 %251 }
 0x102   : > { %261 = vst.msk [vmem:[#allocation2] sm:$0xff] %vm260_vm1, %v252_v14  ;;  %vm661_vm1 = vmpackc.low %vm835_vm10, %vm748_vm7 }
 0x105   : > { %v254_v15 = vpop.permute.xlu1 %253 }
 0x106   : > { %v801_v16 = vsel %vm255_vm2, %v252_v14, %v254_v15  ;;  %263 = vst.msk [vmem:[#allocation2 + $0x10] sm:$0xff] %vm255_vm2, %v254_v15  ;;  %vm414_vm2 = vcmask 785408  }
 0x109   : > { %v803_v17 = vld [vmem:[#allocation2] sm:$0xff] }
 0x10a   : > { %326 = vrot.lane.b32.xlu0 %v803_v17, %s740_s29  ;;  %307 = vrot.lane.b32.xlu1 %v803_v17, %s741_s30 }
 0x10d   : > { %v343_v18 = vld [vmem:[#allocation2 + $0x10] sm:$0xff] }
 0x10e   : > { %368 = vrot.lane.b32.xlu0 %v803_v17, %s742_s6  ;;  %347 = vrot.lane.b32.xlu1 %v803_v17, %s743_s7  ;;  %v703_v19 = vpack.i.bf16 %v343_v18, %v801_v16 }
 0x112   : > { %408 = vrot.lane.b32.xlu0 %v803_v17, %s744_s8  ;;  %387 = vrot.lane.b32.xlu1 %v803_v17, %s745_s9 }
 0x116   : > { %704 = vrot.lane.b32.xlu1 %v703_v19, %s743_s7  ;;  %694 = vrot.lane.b32.xlu0 %v703_v19, %s741_s30 }
 0x11a   : > { %714 = vrot.lane.b32.xlu1 %v703_v19, %s745_s9  ;;  %699 = vrot.lane.b32.xlu0 %v703_v19, %s740_s29 }
 0x11e   : > { %724 = vrot.lane.b32.xlu1 %v703_v19, %s746_s10  ;;  %709 = vrot.lane.b32.xlu0 %v703_v19, %s742_s6 }
 0x122   : > { %429 = vrot.lane.b32.xlu1 %v803_v17, %s746_s10  ;;  %719 = vrot.lane.b32.xlu0 %v703_v19, %s744_s8 }
 0x126   : > { %452 = vrot.lane.b32.xlu1 %v343_v18, %s747_s11  ;;  %450 = vrot.lane.b32.xlu0 %v801_v16, %s747_s11 }
 0x12a   : > { %448 = vrot.lane.b32.xlu0 %v803_v17, %s747_s11  ;;  %485 = vperm.xlu1 %728, %v482_v20  }
 0x17c   : > { %v327_v22 = vpop.permute.xlu0 %326  ;;  %v308_v23 = vpop.permute.xlu1 %307 }
 0x180   : > { %v369_v25 = vpop.permute.xlu0 %368  ;;  %v348_v26 = vpop.permute.xlu1 %347 }
 0x184   : > { %v818_v28 = vpop.permute.xlu0 %408  ;;  %v388_v29 = vpop.permute.xlu1 %387 }
 0x188   : > { %v695_v32 = vpop.permute.xlu0 %694  ;;  %v705_v33 = vpop.permute.xlu1 %704 }
 0x189   : > { %v697_v35 = vunpack.i.h.bf16 %v695_v32  ;;  %v696_v36 = vunpack.i.l.bf16 %v695_v32  ;;  %v707_v38 = vunpack.i.h.bf16 %v705_v33  ;;  %v706_v39 = vunpack.i.l.bf16 %v705_v33 }
 0x18b   : > { %v315_v40 = vsel %vm313_vm4, %v696_v36, %v697_v35  ;;  %v314_v42 = vsel %vm313_vm4, %v308_v23, %v696_v36  ;;  %v354_v54 = vsel %vm353_vm6, %v348_v26, %v706_v39  ;;  %v355_v55 = vsel %vm353_vm6, %v706_v39, %v707_v38  ;;  %vm664_vm4 = vmpackc.low %vm848_vm12, %vm748_vm7  ;;  %v463_v23 = vld [vmem:[%s899_s3] sm:$0xff] }
 0x18c   : > { %v700_v43 = vpop.permute.xlu0 %699  ;;  %v715_v44 = vpop.permute.xlu1 %714  ;;  %v648_v46 = vpack.c.bf16 %v315_v40, %v801_v16  ;;  %v651_v47 = vpack.c.bf16 %v314_v42, %v803_v17  ;;  %vm488_vm6 = vcmask 588800  }
 0x18d   : > { %v702_v49 = vunpack.i.h.bf16 %v700_v43  ;;  %v701_v50 = vunpack.i.l.bf16 %v700_v43  ;;  %v717_v52 = vunpack.i.h.bf16 %v715_v44  ;;  %v716_v53 = vunpack.i.l.bf16 %v715_v44 }
 0x18e   : > { %650 = vmatprep.subr.msk.bf16.mxu0 %vm831_vm8, %v648_v46 }
 0x18f   : > { %v333_v56 = vsel %vm332_vm9, %v327_v22, %v701_v50  ;;  %v334_v57 = vsel %vm332_vm9, %v701_v50, %v702_v49  ;;  %653 = vmatpush1.bf16.msk.msra.mxu0 %vm844_vm11, %v651_v47  ;;  %v394_v0 = vsel %vm393_vm13, %v388_v29, %v716_v53  ;;  %v395_v1 = vsel %vm393_vm13, %v716_v53, %v717_v52 }
 0x190   : > { %v654_v58 = vpack.c.bf16 %v355_v55, %v334_v57  ;;  %v657_v59 = vpack.c.bf16 %v354_v54, %v333_v56  ;;  %v710_v60 = vpop.permute.xlu0 %709  ;;  %v725_v61 = vpop.permute.xlu1 %724 }
 0x191   : > { %v712_v62 = vunpack.i.h.bf16 %v710_v60  ;;  %v711_v63 = vunpack.i.l.bf16 %v710_v60  ;;  %v727_v4 = vunpack.i.h.bf16 %v725_v61  ;;  %v726_v5 = vunpack.i.l.bf16 %v725_v61 }
 0x192   : > { %656 = vmatprep.subr.msk.bf16.mxu0 %vm655_vm14, %v654_v58 }
 0x193   : > { %v375_v2 = vsel %vm374_vm15, %v369_v25, %v711_v63  ;;  %v376_v3 = vsel %vm374_vm15, %v711_v63, %v712_v62  ;;  %659 = vmatpush1.bf16.msk.msra.mxu0 %vm658_vm0, %v657_v59  ;;  %v437_v15 = vsel %vm435_vm3, %v726_v5, %v727_v4 }
 0x194   : > { %v660_v6 = vpack.c.bf16 %v395_v1, %v376_v3  ;;  %v663_v7 = vpack.c.bf16 %v394_v0, %v375_v2  ;;  %v720_v8 = vpop.permute.xlu0 %719  ;;  %v430_v9 = vpop.permute.xlu1 %429 }
 0x195   : > { %v722_v10 = vunpack.i.h.bf16 %v720_v8  ;;  %v721_v11 = vunpack.i.l.bf16 %v720_v8  ;;  %v436_v14 = vsel %vm435_vm3, %v430_v9, %v726_v5 }
 0x196   : > { %662 = vmatprep.subr.msk.bf16.mxu0 %vm661_vm1, %v660_v6 }
 0x197   : > { %v415_v12 = vsel %vm414_vm2, %v818_v28, %v721_v11  ;;  %v416_v13 = vsel %vm414_vm2, %v721_v11, %v722_v10  ;;  %665 = vmatpush1.bf16.msk.msra.mxu0 %vm664_vm4, %v663_v7 }
 0x198   : > { %v666_v16 = vpack.c.bf16 %v437_v15, %v416_v13  ;;  %v669_v17 = vpack.c.bf16 %v436_v14, %v415_v12  ;;  %v451_v18 = vpop.permute.xlu0 %450  ;;  %v453_v19 = vpop.permute.xlu1 %452 }
 0x199   : > { %v456_v20 = vsel %vm454_vm5, %v451_v18, %v453_v19 }
 0x19a   : > { %668 = vmatprep.subr.msk.bf16.mxu0 %vm831_vm8, %v666_v16 }
 0x19b   : > { %671 = vmatpush1.bf16.msk.msra.mxu0 %vm844_vm11, %v669_v17 }
 0x19c   : > { %v449_v21 = vpop.permute.xlu0 %448  ;;  %646 = vmatprep.subr.msk.mxu0 %vm835_vm10, %v456_v20 }
 0x19d   : > { %v455_v22 = vsel %vm454_vm5, %v449_v21, %v451_v18 }
 0x19f   : > { %647 = vmatpush1.msk.msra.mxu0 %vm848_vm12, %v455_v22 }
 0x1a0   : > { %631 = vmatmul.mubr.msk.f32.vlgmr.msra.gmra.mrb[0].mxu0 %vm488_vm6, %v463_v23 }
 0x1a9   : > { %v486_v24 = vpop.permute.xlu1 %485 }
 0x273   : > { %v558_v25 = vpop.f32.mrb[0].mxu0 }
 0x274   : > { %v559_v26 = vadd.f32 %v558_v25, %v486_v24  ;;  %v560_v27 = vpop.f32.mrb[1].mxu0 }
 0x275   : > { %v561_v28 = vadd.f32 %v560_v27, %v486_v24 }
 0x276   : > { %v563_v29 = vmax.f32 %v559_v26, 0.0 }
 0x277   : > { %v564_v30 = vmax.f32 %v561_v28, 0.0 }
 0x278   : > { %565 = vst [vmem:[%s224_s20] sm:$0xff] %v563_v29 }
 0x279   : > { %566 = vst [vmem:[%s224_s20 + $0x8] sm:$0xff] %v564_v30 }
 0x27a PF: > { %s15_s18 = sadd.s32 1, %s735_s18  }
 0x27b   : > { %p12_p4 = scmp.ge.s32.totalorder %s15_s18, 4  }
 0x27d   :  { %14 = sbr.rel (!%p12_p4) target bundleno = 1 (0x1), region = 70 }

</bundles_post_ra>
